<compile_context>
chip_gen: v5e
topology: v5e:2x2
jax: 0.10.0
libtpu: 0.0.40
codegen_flags: <defaults>
</compile_context>

<pallas_src>
import jax
import jax.numpy as jnp
from jax.experimental import pallas as pl
from jax.experimental.pallas import tpu as pltpu


def _round_up(n, m):
    return ((n + m - 1) // m) * m


def _vmem_capacity_bytes():
    try:
        return int(pltpu.get_tpu_info().vmem_capacity_bytes)
    except Exception:
        return 64 << 20  # conservative fallback: v7x per-core VMEM


def _sigmoid_ffnet_kernel(x_ref, w1_ref, b1_ref, w2_ref, b2_ref, o_ref, h_ref):
    # Layer 1 (Linear + Sigmoid) runs once per batch tile, at out-tile index j==0;
    # the activation is cached in VMEM scratch and reused for every out-tile j.
    @pl.when(pl.program_id(1) == 0)
    def _():
        h = jnp.dot(x_ref[...], w1_ref[...], preferred_element_type=jnp.float32)
        h = jax.nn.sigmoid(h + b1_ref[...].astype(jnp.float32))   # f32 bias + EUP sigmoid
        h_ref[...] = h.astype(h_ref.dtype)                        # back to MXU operand dtype

    # Layer 2 (Linear + Sigmoid) on the current out-tile.
    y = jnp.dot(h_ref[...], w2_ref[...], preferred_element_type=jnp.float32)
    y = jax.nn.sigmoid(y + b2_ref[...].astype(jnp.float32))
    o_ref[...] = y.astype(o_ref.dtype)


def prepare_params(w1, b1, w2, b2):
    """One-time parameter packing; call once and reuse across forward passes.

    Pads hidden and out dims to multiples of 128 lanes.  Numerically exact:
    padded hidden columns yield sigmoid(0)=0.5 activations but multiply the
    zero-padded w2 rows; padded out columns are sliced off after the kernel.
    """
    in_size, hidden = w1.shape
    hidden2, out_size = w2.shape
    assert hidden2 == hidden and b1.shape == (hidden,) and b2.shape == (out_size,)

    hidden_pad = _round_up(hidden, 128)
    out_pad = _round_up(out_size, 128)
    if hidden_pad != hidden:
        w1 = jnp.pad(w1, ((0, 0), (0, hidden_pad - hidden)))
        b1 = jnp.pad(b1, ((0, hidden_pad - hidden),))
        w2 = jnp.pad(w2, ((0, hidden_pad - hidden), (0, 0)))      # zero ROWS -> exact
    if out_pad != out_size:
        w2 = jnp.pad(w2, ((0, 0), (0, out_pad - out_size)))
        b2 = jnp.pad(b2, ((0, out_pad - out_size),))

    return {
        "w1": w1,                              # (in_size, hidden_pad)
        "b1": b1.reshape(1, hidden_pad),       # (1, hidden_pad)
        "w2": w2,                              # (hidden_pad, out_pad)
        "b2": b2.reshape(1, out_pad),          # (1, out_pad)
        "out_size": out_size,
    }


def _choose_out_tile(out_pad, hidden_pad, in_size, elem, vmem_cap):
    """Largest 128-multiple divisor of out_pad keeping resident weights <= ~40% VMEM."""
    w1_bytes = in_size * hidden_pad * elem
    budget = int(0.4 * vmem_cap)
    m = out_pad // 128
    best = 1
    for d in range(1, m + 1):
        if m % d:
            continue
        tn = 128 * d
        w2_bufs = 1 if tn == out_pad else 2    # tiled w2 is double-buffered
        if w1_bytes + w2_bufs * hidden_pad * tn * elem <= budget:
            best = d
    # TODO(synk): if even tn=128 (or w1 alone) exceeds the budget, add K-tiling with
    # an f32 accumulator and a trailing "arbitrary" reduction axis.
    return 128 * best


def sigmoid_ffnet(x, params, *, max_batch_tile=None, matmul_dtype=None):
    """Fused forward pass: sigmoid(sigmoid(x @ w1 + b1) @ w2 + b2)."""
    w1, b1, w2, b2 = params["w1"], params["b1"], params["w2"], params["b2"]
    out_size = params["out_size"]

    B, in_size = x.shape
    assert w1.shape[0] == in_size
    hidden_pad = w1.shape[1]
    out_pad = w2.shape[1]

    out_dtype = x.dtype
    if matmul_dtype is not None:               # optional (e.g. bf16 operands on v5e)
        x = x.astype(matmul_dtype)
        w1 = w1.astype(matmul_dtype)
        w2 = w2.astype(matmul_dtype)
    op_dtype = x.dtype
    elem = jnp.dtype(op_dtype).itemsize
    sublane = {4: 8, 2: 16, 1: 32}.get(elem, 8)

    vmem_cap = _vmem_capacity_bytes()

    # --- batch tiling: balanced tiles, generation-aware maximum -----------------
    if max_batch_tile is None:
        max_batch_tile = 512 if vmem_cap < (100 << 20) else (2048 if elem < 4 else 1024)
    nb = pl.cdiv(B, max_batch_tile)
    tb = _round_up(pl.cdiv(B, nb), sublane)
    if tb >= 256:
        tb = _round_up(tb, 256)                # MXU M granularity on v6e/v7x
    b_pad = _round_up(B, tb)
    if b_pad != B:
        x = jnp.pad(x, ((0, b_pad - B), (0, 0)))

    # --- out tiling: keep resident weights bounded (tiled fallback) -------------
    tn = _choose_out_tile(out_pad, hidden_pad, in_size, elem, vmem_cap)
    n_tiles = out_pad // tn
    grid = (b_pad // tb, n_tiles)

    # --- VMEM budget (single-buffered resident weights, both f32 accumulators) --
    w2_bufs = 1 if n_tiles == 1 else 2
    vmem_bytes = (
        2 * tb * in_size * elem                          # double-buffered x tiles
        + 2 * tb * tn * elem                             # double-buffered out tiles
        + (in_size * hidden_pad + hidden_pad) * elem     # resident w1 + b1
        + w2_bufs * (hidden_pad * tn + tn) * elem        # w2 + b2 (tiled -> 2 bufs)
        + tb * hidden_pad * elem                         # h scratch (VMEM)
        + tb * hidden_pad * 4 + tb * tn * 4              # layer-1/2 f32 accumulators
    )
    vmem_limit = min(max(int(1.25 * vmem_bytes) + (4 << 20), 32 << 20),
                     int(0.9 * vmem_cap))                # headroom for Mosaic scratch

    cost = pl.CostEstimate(
        flops=2 * b_pad * (in_size * hidden_pad + hidden_pad * out_pad),
        transcendentals=b_pad * (hidden_pad + out_pad),
        bytes_accessed=(b_pad * in_size + in_size * hidden_pad + hidden_pad
                        + hidden_pad * out_pad + out_pad + b_pad * out_pad) * elem,
    )

    resident = pl.Buffered(1)                            # fetched once, never re-fetched
    w2_mode = pl.Buffered(1) if n_tiles == 1 else None   # default double-buffer if tiled

    out = pl.pallas_call(
        _sigmoid_ffnet_kernel,
        out_shape=jax.ShapeDtypeStruct((b_pad, out_pad), out_dtype),
        grid_spec=pltpu.PrefetchScalarGridSpec(
            num_scalar_prefetch=0,
            grid=grid,
            in_specs=[
                pl.BlockSpec((tb, in_size), lambda i, j: (i, 0)),                       # x tile
                pl.BlockSpec((in_size, hidden_pad), lambda i, j: (0, 0),
                             pipeline_mode=resident),                                   # w1
                pl.BlockSpec((1, hidden_pad), lambda i, j: (0, 0),
                             pipeline_mode=resident),                                   # b1
                pl.BlockSpec((hidden_pad, tn), lambda i, j: (0, j),
                             pipeline_mode=w2_mode),                                    # w2
                pl.BlockSpec((1, tn), lambda i, j: (0, j),
                             pipeline_mode=w2_mode),                                    # b2
            ],
            out_specs=pl.BlockSpec((tb, tn), lambda i, j: (i, j)),
            scratch_shapes=[pltpu.VMEM((tb, hidden_pad), op_dtype)],                    # h cache
        ),
        compiler_params=pltpu.CompilerParams(
            # batch axis parallel (megacore-shardable); out axis carries the h-scratch
            # dependency -> "arbitrary", innermost.
            dimension_semantics=("parallel", "arbitrary"),
            vmem_limit_bytes=int(vmem_limit),
        ),
        cost_estimate=cost,
    )(x, w1, b1, w2, b2)

    # Slice off batch / lane padding outside the kernel.
    return out[:B, :out_size]


def init_params(key, in_size, hidden_size, out_size, dtype=jnp.float32):
    """Deterministic init mimicking nn.Linear default (uniform +/- 1/sqrt(fan_in))."""
    k1, k2, k3, k4 = jax.random.split(key, 4)
    bound1 = 1.0 / (in_size ** 0.5)
    bound2 = 1.0 / (hidden_size ** 0.5)
    w1 = jax.random.uniform(k1, (in_size, hidden_size), dtype, -bound1, bound1)
    b1 = jax.random.uniform(k2, (hidden_size,), dtype, -bound1, bound1)
    w2 = jax.random.uniform(k3, (hidden_size, out_size), dtype, -bound2, bound2)
    b2 = jax.random.uniform(k4, (out_size,), dtype, -bound2, bound2)
    return w1, b1, w2, b2


if __name__ == "__main__":
    key = jax.random.PRNGKey(0)
    kx, kp = jax.random.split(key)

    B, in_size, hidden_size, out_size = 8, 16, 32, 8
    x = jax.random.normal(kx, (B, in_size), jnp.float32)
    w1, b1, w2, b2 = init_params(kp, in_size, hidden_size, out_size)

    params = prepare_params(w1, b1, w2, b2)   # one-time weight packing
    out = sigmoid_ffnet(x, params)
    out = jax.block_until_ready(out)

    # Reference check in plain JAX.
    h_ref = jax.nn.sigmoid(x @ w1 + b1)
    y_ref = jax.nn.sigmoid(h_ref @ w2 + b2)
    assert out.shape == (B, out_size)
    assert jnp.allclose(out, y_ref, atol=2e-5, rtol=2e-5)

    print("KERNEL_OK")
</pallas_src>

<mosaic_0001>
module attributes {stable_mosaic.version = 11 : i64} {
  func.func @_sigmoid_ffnet_kernel(%arg0: i32, %arg1: i32, %arg2: memref<8x16xf32, #tpu.memory_space<vmem>>, %arg3: memref<16x128xf32, #tpu.memory_space<vmem>>, %arg4: memref<1x128xf32, #tpu.memory_space<vmem>>, %arg5: memref<128x128xf32, #tpu.memory_space<vmem>>, %arg6: memref<1x128xf32, #tpu.memory_space<vmem>>, %arg7: memref<8x128xf32, #tpu.memory_space<vmem>>, %arg8: memref<8x128xf32, #tpu.memory_space<vmem>>) attributes {dimension_semantics = [#tpu.dimension_semantics<parallel>, #tpu.dimension_semantics<arbitrary>], iteration_bounds = array<i64: 1, 1>, scalar_prefetch = 0 : i64, scratch_operands = 1 : i64, tpu.core_type = #tpu.core_type<tc>, window_params = [{transform_indices = @transform_0, window_bounds = array<i64: 8, 16>}, {pipeline_mode = #tpu.pipeline_mode<synchronous>, transform_indices = @transform_1, window_bounds = array<i64: 16, 128>}, {pipeline_mode = #tpu.pipeline_mode<synchronous>, transform_indices = @transform_2, window_bounds = array<i64: 1, 128>}, {pipeline_mode = #tpu.pipeline_mode<synchronous>, transform_indices = @transform_3, window_bounds = array<i64: 128, 128>}, {pipeline_mode = #tpu.pipeline_mode<synchronous>, transform_indices = @transform_4, window_bounds = array<i64: 1, 128>}, {transform_indices = @transform_5, window_bounds = array<i64: 8, 128>}]} {
    %c0_i32 = arith.constant 0 : i32
    %0 = arith.cmpi eq, %arg1, %c0_i32 : i32
    %1 = arith.extui %0 : i1 to i32
    %c0_i32_0 = arith.constant 0 : i32
    %2 = arith.cmpi ne, %1, %c0_i32_0 : i32
    scf.if %2 {
      %c0_9 = arith.constant 0 : index
      %c0_10 = arith.constant 0 : index
      %15 = vector.load %arg2[%c0_9, %c0_10] : memref<8x16xf32, #tpu.memory_space<vmem>>, vector<8x16xf32>
      %c0_11 = arith.constant 0 : index
      %c0_12 = arith.constant 0 : index
      %16 = vector.load %arg3[%c0_11, %c0_12] : memref<16x128xf32, #tpu.memory_space<vmem>>, vector<16x128xf32>
      %cst_13 = arith.constant dense<0.000000e+00> : vector<8x128xf32>
      %17 = tpu.matmul %15, %16, %cst_13 {dimension_numbers = #tpu.dot_dimension_numbers<[1], [0], [0], [1], [0, 0, 1, 1], [], []>} : vector<8x16xf32>, vector<16x128xf32>, vector<8x128xf32> -> vector<8x128xf32>
      %c0_14 = arith.constant 0 : index
      %c0_15 = arith.constant 0 : index
      %18 = vector.load %arg4[%c0_14, %c0_15] : memref<1x128xf32, #tpu.memory_space<vmem>>, vector<1x128xf32>
      %19 = vector.broadcast %18 : vector<1x128xf32> to vector<8x128xf32>
      %20 = arith.addf %17, %19 : vector<8x128xf32>
      %21 = arith.negf %20 : vector<8x128xf32>
      %22 = math.exp %21 : vector<8x128xf32>
      %cst_16 = arith.constant 1.000000e+00 : f32
      %23 = vector.broadcast %cst_16 : f32 to vector<8x128xf32>
      %24 = arith.addf %23, %22 : vector<8x128xf32>
      %25 = arith.divf %23, %24 : vector<8x128xf32>
      %c0_17 = arith.constant 0 : index
      %c0_18 = arith.constant 0 : index
      %26 = vector.load %arg8[%c0_17, %c0_18] : memref<8x128xf32, #tpu.memory_space<vmem>>, vector<8x128xf32>
      tpu.vector_store %arg8[%c0_17, %c0_18], %25 {strides = array<i32>} : memref<8x128xf32, #tpu.memory_space<vmem>>, vector<8x128xf32>,
    } else {
    }
    %c0 = arith.constant 0 : index
    %c0_1 = arith.constant 0 : index
    %3 = vector.load %arg8[%c0, %c0_1] : memref<8x128xf32, #tpu.memory_space<vmem>>, vector<8x128xf32>
    %c0_2 = arith.constant 0 : index
    %c0_3 = arith.constant 0 : index
    %4 = vector.load %arg5[%c0_2, %c0_3] : memref<128x128xf32, #tpu.memory_space<vmem>>, vector<128x128xf32>
    %cst = arith.constant dense<0.000000e+00> : vector<8x128xf32>
    %5 = tpu.matmul %3, %4, %cst {dimension_numbers = #tpu.dot_dimension_numbers<[1], [0], [0], [1], [0, 0, 1, 1], [], []>} : vector<8x128xf32>, vector<128x128xf32>, vector<8x128xf32> -> vector<8x128xf32>
    %c0_4 = arith.constant 0 : index
    %c0_5 = arith.constant 0 : index
    %6 = vector.load %arg6[%c0_4, %c0_5] : memref<1x128xf32, #tpu.memory_space<vmem>>, vector<1x128xf32>
    %7 = vector.broadcast %6 : vector<1x128xf32> to vector<8x128xf32>
    %8 = arith.addf %5, %7 : vector<8x128xf32>
    %9 = arith.negf %8 : vector<8x128xf32>
    %10 = math.exp %9 : vector<8x128xf32>
    %cst_6 = arith.constant 1.000000e+00 : f32
    %11 = vector.broadcast %cst_6 : f32 to vector<8x128xf32>
    %12 = arith.addf %11, %10 : vector<8x128xf32>
    %13 = arith.divf %11, %12 : vector<8x128xf32>
    %c0_7 = arith.constant 0 : index
    %c0_8 = arith.constant 0 : index
    %14 = vector.load %arg7[%c0_7, %c0_8] : memref<8x128xf32, #tpu.memory_space<vmem>>, vector<8x128xf32>
    tpu.vector_store %arg7[%c0_7, %c0_8], %13 {strides = array<i32>} : memref<8x128xf32, #tpu.memory_space<vmem>>, vector<8x128xf32>,
    return
  }
  func.func @transform_0(%arg0: i32, %arg1: i32) -> (i32, i32) {
    %c0_i32 = arith.constant 0 : i32
    %c0_i32_0 = arith.constant 0 : i32
    return %arg0, %c0_i32 : i32, i32
  }
  func.func @transform_1(%arg0: i32, %arg1: i32) -> (i32, i32) {
    %c0_i32 = arith.constant 0 : i32
    %c0_i32_0 = arith.constant 0 : i32
    %c0_i32_1 = arith.constant 0 : i32
    return %c0_i32, %c0_i32_0 : i32, i32
  }
  func.func @transform_2(%arg0: i32, %arg1: i32) -> (i32, i32) {
    %c0_i32 = arith.constant 0 : i32
    %c0_i32_0 = arith.constant 0 : i32
    %c0_i32_1 = arith.constant 0 : i32
    return %c0_i32, %c0_i32_0 : i32, i32
  }
  func.func @transform_3(%arg0: i32, %arg1: i32) -> (i32, i32) {
    %c0_i32 = arith.constant 0 : i32
    %c0_i32_0 = arith.constant 0 : i32
    return %c0_i32, %arg1 : i32, i32
  }
  func.func @transform_4(%arg0: i32, %arg1: i32) -> (i32, i32) {
    %c0_i32 = arith.constant 0 : i32
    %c0_i32_0 = arith.constant 0 : i32
    return %c0_i32, %arg1 : i32, i32
  }
  func.func @transform_5(%arg0: i32, %arg1: i32) -> (i32, i32) {
    %c0_i32 = arith.constant 0 : i32
    return %arg0, %arg1 : i32, i32
  }
}

</mosaic_0001>

<bundles_post_ra>
// kernel: tpu_custom_call.1
= control target key start
LH: loop header
LB: loop body
LE: loop exit
PB: predicated region body
PF: predicated region fallthrough
CT: control target
= control target key end

     0   :  { %10 = vsyncpa [#allocation4], 0  ;;  %s375_s0 = inlined_call_operand.hbm [shape: f32[8,16], index: 0, kind: input, shape index: {}]   ;;  %s376_s1 = inlined_call_operand.hbm [shape: f32[16,128], index: 1, kind: input, shape index: {}]   ;;  %s377_s2 = inlined_call_operand.vmem [shape: f32[1,128], index: 2, kind: input, shape index: {}]   ;;  %s378_s3 = inlined_call_operand.hbm [shape: f32[128,128], index: 3, kind: input, shape index: {}]   ;;  %s379_s4 = inlined_call_operand.vmem [shape: f32[1,128], index: 4, kind: input, shape index: {}]   ;;  %s380_s5 = inlined_call_operand.hbm [shape: f32[8,128], index: 5, kind: output, shape index: {}]  }
   0x1   :  { %11 = vsyncpa [#allocation7], 0  ;;  %s28_s20 = sshll.u32 %s376_s1, 4  ;;  %s29_s20 = int_to_ptr.hbm [resolvable:$true] %s28_s20 }
   0x2   :  { %12 = vsyncpa [#allocation5], 0  ;;  %s321_s21 = smov [#allocation6]   ;;  %s18_s25 = sshll.u32 %s375_s0, 4  ;;  %s19_s25 = int_to_ptr.hbm [resolvable:$true] %s18_s25 }
   0x3   :  { %s30_s22 = sshll.u32 %s321_s21, 4  ;;  %s322_s26 = smov 128   ;;  %s31_s22 = int_to_ptr.vmem [resolvable:$true] %s30_s22 }
   0x4   :  { %s323_s27 = smov 8   ;;  %s324_s28 = smov [#allocation3]  }
   0x5   :  { %36 = dma.hbm_to_vmem [thread:$0]  %s29_s20, 256, %s31_s22, [#allocation7], %s322_s26, %s322_s26, %s323_s27  }
   0x6   :  { %s20_s29 = sshll.u32 %s324_s28, 4  ;;  %s43_s7 = sshll.u32 %s378_s3, 4  ;;  %s21_s29 = int_to_ptr.vmem [resolvable:$true] %s20_s29  ;;  %s44_s7 = int_to_ptr.hbm [resolvable:$true] %s43_s7 }
   0x7   :  { %23 = dma.hbm_to_vmem [thread:$0]  %s19_s25, 128, %s21_s29, [#allocation4]  }
   0x8   :  { %s325_s1 = smov [#allocation8]  }
   0x9   :  { %s45_s8 = sshll.u32 %s325_s1, 4  ;;  %s46_s8 = int_to_ptr.vmem [resolvable:$true] %s45_s8 }
   0xa   :  { %51 = dma.hbm_to_vmem [thread:$0]  %s44_s7, 2048, %s46_s8, [#allocation7], %s322_s26, %s322_s26, %s323_s27  }
   0xb   :  { %315 = dma.done.wait [#allocation4], 128  }
   0xc   :  { %316 = vsyncadd [#allocation4], 4294967168 }
   0xd   :  { %317 = dma.done.wait [#allocation7], 2304  }
   0xe   :  { %318 = vsyncadd [#allocation7], 4294964992  ;;  %v72_v0 = vld [vmem:[#allocation6 + $0x8] sm:$0xff]  ;;  %v71_v1 = vld [vmem:[#allocation6] sm:$0xff]  ;;  %vm77_vm0 = vcmask 130048   ;;  %s326_s10 = smov [#allocation9]  }
   0xf   :  { %95 = vmatpush.msra.mxu0 %v72_v0  ;;  %v70_v2 = vld [vmem:[#allocation3] sm:$0xff]  ;;  %v137_v3 = vld [vmem:[#allocation8 + $0x78] sm:$0xff]  ;;  %v136_v4 = vld [vmem:[#allocation8 + $0x70] sm:$0xff]  ;;  %s187_s11 = sshll.u32 %s326_s10, 4  ;;  %s188_s11 = int_to_ptr.vmem [resolvable:$true] %s187_s11 }
  0x10   :  { %142 = vmatpush.msra.mxu1 %v137_v3  ;;  %v135_v5 = vld [vmem:[#allocation8 + $0x68] sm:$0xff]  ;;  %v134_v6 = vld [vmem:[#allocation8 + $0x60] sm:$0xff]  ;;  %v133_v7 = vld [vmem:[#allocation8 + $0x58] sm:$0xff] }
  0x11   :  { %96 = vmatpush.msra.mxu0 %v71_v1  ;;  %v132_v8 = vld [vmem:[#allocation8 + $0x50] sm:$0xff]  ;;  %v131_v9 = vld [vmem:[#allocation8 + $0x48] sm:$0xff]  ;;  %v130_v10 = vld [vmem:[#allocation8 + $0x40] sm:$0xff] }
  0x12   :  { %200 = vmatmul.msk.f32.vlgmr.msra.gmra.mxu0 %vm77_vm0, %v70_v2  ;;  %143 = vmatpush.msra.mxu1 %v136_v4  ;;  %v129_v11 = vld [vmem:[#allocation8 + $0x38] sm:$0xff]  ;;  %v128_v12 = vld [vmem:[#allocation8 + $0x30] sm:$0xff]  ;;  %v127_v13 = vld [vmem:[#allocation8 + $0x28] sm:$0xff] }
  0x13   :  { %v126_v14 = vld [vmem:[#allocation8 + $0x20] sm:$0xff]  ;;  %v125_v15 = vld [vmem:[#allocation8 + $0x18] sm:$0xff]  ;;  %v124_v16 = vld [vmem:[#allocation8 + $0x10] sm:$0xff] }
  0x14   :  { %144 = vmatpush.msra.mxu1 %v135_v5  ;;  %v123_v17 = vld [vmem:[#allocation8 + $0x8] sm:$0xff]  ;;  %v122_v18 = vld [vmem:[#allocation8] sm:$0xff] }
  0x15   :  { %v209_v19 = vld [vmem:[%s377_s2] ss:$0 sm:$0xff] }
  0x16   :  { %145 = vmatpush.msra.mxu1 %v134_v6  ;;  %v210_v35 = vld [vmem:[%s379_s4] ss:$0 sm:$0xff]  ;;  %s189_s4 = sshll.u32 %s380_s5, 4  ;;  %s190_s4 = int_to_ptr.hbm [resolvable:$true] %s189_s4 }
  0x18   :  { %146 = vmatpush.msra.mxu1 %v133_v7 }
  0x1a   :  { %147 = vmatpush.msra.mxu1 %v132_v8 }
  0x1c   :  { %148 = vmatpush.msra.mxu1 %v131_v9 }
  0x1e   :  { %149 = vmatpush.msra.mxu1 %v130_v10 }
  0x20   :  { %150 = vmatpush.msra.mxu1 %v129_v11 }
  0x22   :  { %151 = vmatpush.msra.mxu1 %v128_v12 }
  0x24   :  { %152 = vmatpush.msra.mxu1 %v127_v13 }
  0x26   :  { %153 = vmatpush.msra.mxu1 %v126_v14 }
  0x28   :  { %154 = vmatpush.msra.mxu1 %v125_v15 }
  0x2a   :  { %155 = vmatpush.msra.mxu1 %v124_v16 }
  0x2c   :  { %156 = vmatpush.msra.mxu1 %v123_v17 }
  0x2e   :  { %157 = vmatpush.msra.mxu1 %v122_v18 }
  0x8f   :  { %v98_v20 = vpop.f32.mrf.mxu0 }
  0x90   :  { %v99_v21 = vadd.f32 %v209_v19, %v98_v20 }
  0x92   :  { %v201_v22 = vmul.f32 -1.442695, %v99_v21 }
  0x94   :  { %211 = vpow2.f32 %v201_v22 }
  0x9a   :  { %v212_v23 = vpop.eup %211 }
  0x9b   :  { %v104_v24 = vadd.f32 1.0, %v212_v23 }
  0x9d   :  { %213 = vrcp.f32 %v104_v24  ;;  %v116_v28 = vand.u32 2147483648, %v104_v24  ;;  %v114_v30 = vand.u32 2147483647, %v104_v24  ;;  %vm110_vm2 = vweird.f32 %v104_v24 }
  0x9f   :  { %v117_v32 = vor.u32 1.1754944e-38, %v116_v28  ;;  %vm115_vm4 = vcmp.eq.f32.partialorder %v114_v30, 8.507059e+37 }
  0xa3   :  { %v214_v25 = vpop.eup %213 }
  0xa4   :  { %v106_v26 = vmul.f32 %v214_v25, %v104_v24  ;;  %vm111_vm1 = vweird.f32 %v214_v25 }
  0xa5   :  { %vm112_vm3 = vmor %vm110_vm2, %vm111_vm1 }
  0xa6   :  { %v107_v27 = vsub.f32 1.0, %v106_v26 }
  0xa8   :  { %v108_v29 = vmul.f32 %v214_v25, %v107_v27 }
  0xaa   :  { %v109_v31 = vadd.f32 %v214_v25, %v108_v29 }
  0xac   :  { %v113_v33 = vsel %vm112_vm3, %v214_v25, %v109_v31 }
  0xad   :  { %v118_v34 = vsel %vm115_vm4, %v117_v32, %v113_v33 }
  0xae   :  { %158 = vmatmul.f32.vlgmr.msra.gmra.mxu1 %v118_v34 }
 0x12b   :  { %v159_v36 = vpop.f32.mrf.mxu1 }
 0x12c   :  { %v160_v37 = vadd.f32 %v210_v35, %v159_v36 }
 0x12e   :  { %v202_v38 = vmul.f32 -1.442695, %v160_v37 }
 0x130   :  { %215 = vpow2.f32 %v202_v38 }
 0x136   :  { %v216_v39 = vpop.eup %215 }
 0x137   :  { %v165_v40 = vadd.f32 1.0, %v216_v39 }
 0x139   :  { %217 = vrcp.f32 %v165_v40  ;;  %v177_v44 = vand.u32 2147483648, %v165_v40  ;;  %v175_v46 = vand.u32 2147483647, %v165_v40  ;;  %vm171_vm6 = vweird.f32 %v165_v40 }
 0x13b   :  { %v178_v48 = vor.u32 1.1754944e-38, %v177_v44  ;;  %vm176_vm8 = vcmp.eq.f32.partialorder %v175_v46, 8.507059e+37 }
 0x13f   :  { %v218_v41 = vpop.eup %217 }
 0x140   :  { %v167_v42 = vmul.f32 %v218_v41, %v165_v40  ;;  %vm172_vm5 = vweird.f32 %v218_v41 }
 0x141   :  { %vm173_vm7 = vmor %vm171_vm6, %vm172_vm5 }
 0x142   :  { %v168_v43 = vsub.f32 1.0, %v167_v42 }
 0x144   :  { %v169_v45 = vmul.f32 %v218_v41, %v168_v43 }
 0x146   :  { %v170_v47 = vadd.f32 %v218_v41, %v169_v45 }
 0x148   :  { %v174_v49 = vsel %vm173_vm7, %v218_v41, %v170_v47 }
 0x149   :  { %v179_v50 = vsel %vm176_vm8, %v178_v48, %v174_v49 }
 0x14a   :  { %181 = vst [vmem:[#allocation9] sm:$0xff] %v179_v50 }
 0x14b   :  { %192 = dma.vmem_to_hbm [thread:$0]  %s188_s11, 128, %s190_s4, [#allocation5]  }
 0x14c   :  { %319 = dma.done.wait [#allocation5], 128  }
 0x14d   :  { %320 = vsyncadd [#allocation5], 4294967168 }
 0x14e   :  { %197 = vsyncpa [#allocation4], 1 }
 0x14f   :  { %198 = vsyncpa [#allocation7], 1 }
 0x150   :  { %199 = vsyncpa [#allocation5], 1 }

</bundles_post_ra>
